<compile_context>
chip_gen: v6e
topology: v6e:2x2x1
jax: 0.10.0
libtpu: 0.0.40
codegen_flags: <defaults>
</compile_context>

<pallas_src>
import numpy as np
import jax
import jax.numpy as jnp
from jax.experimental import pallas as pl
from jax.experimental.pallas import tpu as pltpu

BIG_NEG = -1e30
LANE = 128


def _round_up(x, m):
    return ((x + m - 1) // m) * m


# ----------------------------------------------------------------------------
# Static hierarchy preprocessing (numpy) — mirrors the pieces of Hierarchy /
# HierCondLogSoftmax / Sum / uniform_leaf that the forward pass needs.
# ----------------------------------------------------------------------------
def build_tree(parents):
    parents = np.asarray(parents, dtype=np.int64)
    n = len(parents)
    assert np.all(parents[1:] < np.arange(1, n)), "parents must be topological"
    children = {i: [] for i in range(n)}
    for j in range(1, n):
        children[int(parents[j])].append(j)
    num_children = np.array([len(children[i]) for i in range(n)], dtype=np.int64)
    leaf_mask = num_children == 0
    internal = np.flatnonzero(~leaf_mask)
    cond_children = [children[int(x)] for x in internal]
    child_index = np.concatenate(cond_children)                                # (S,)
    group_index = np.concatenate(
        [np.full(len(c), g, dtype=np.int64) for g, c in enumerate(cond_children)])
    col_index = np.concatenate([np.arange(len(c)) for c in cond_children])
    group_size = np.array([len(c) for c in cond_children], dtype=np.int64)
    max_children = int(group_size.max())

    # ancestor_mask(strict=False): is_ancestor[i, j] == "i is ancestor-or-self of j"
    is_desc = np.zeros((n, n), dtype=bool)
    is_desc[0, 0] = True
    for j in range(1, n):
        p = int(parents[j])
        is_desc[j] = is_desc[p]
        is_desc[j, j] = True
    is_ancestor = is_desc.T
    leaf_subset = np.flatnonzero(leaf_mask)
    num_leaves = len(leaf_subset)
    prior = is_ancestor[:, leaf_mask].sum(axis=1) / num_leaves                 # uniform_leaf

    # DFS leaf ordering: descendants of any node form a contiguous rank interval.
    leaf_rank = np.full(n, -1, dtype=np.int64)
    rank = 0
    stack = [0]
    while stack:
        node = stack.pop()
        kids = children[node]
        if not kids:
            leaf_rank[node] = rank
            rank += 1
        else:
            stack.extend(reversed(kids))
    node_lo = np.where(leaf_mask, leaf_rank, n + 1).astype(np.int64)
    node_hi = np.where(leaf_mask, leaf_rank + 1, -1).astype(np.int64)
    for j in range(n - 1, 0, -1):                                              # reverse topo
        p = int(parents[j])
        node_lo[p] = min(node_lo[p], node_lo[j])
        node_hi[p] = max(node_hi[p], node_hi[j])
    assert np.all((node_hi - node_lo) == is_ancestor[:, leaf_mask].sum(axis=1)), \
        "DFS leaf intervals must be contiguous"

    return dict(
        num_nodes=n, num_internal=len(internal), num_leaves=num_leaves,
        max_children=max_children, child_index=child_index, group_index=group_index,
        col_index=col_index, group_size=group_size, is_ancestor=is_ancestor,
        leaf_subset=leaf_subset, leaf_rank=leaf_rank, prior=prior,
        node_lo=node_lo, node_hi=node_hi,
    )


def make_kernel_constants(tree, label_smoothing):
    """Lane-padded static constants (all small: no (L,N) / (S,N) matrices needed)."""
    n = tree["num_nodes"]
    S = n - 1
    NI = tree["num_internal"]
    MC = tree["max_children"]
    L = tree["num_leaves"]
    S_pad = _round_up(S, LANE)
    NI_pad = _round_up(NI, LANE)
    ls = float(label_smoothing)

    gi, ci, ch = tree["group_index"], tree["col_index"], tree["child_index"]

    # A[s, g] = 1 iff child-edge s belongs to sibling group g (padded cols/rows = 0).
    A = np.zeros((S_pad, NI_pad), dtype=np.float32)
    A[np.arange(S), gi] = 1.0
    # Gcat[s, c*NI_pad + g] = 1 iff s is the c-th child of group g (wide one-hot gather,
    # all MC candidate blocks concatenated along lanes for a single MXU matmul).
    Gcat = np.zeros((S_pad, MC * NI_pad), dtype=np.float32)
    Gcat[np.arange(S), ci * NI_pad + gi] = 1.0
    # gbias[0, c*NI_pad + g] = 0 if group g has > c children else -1e30 (also padded g).
    gbias = np.full((MC, NI_pad), BIG_NEG, dtype=np.float32)
    for g in range(NI):
        gbias[: int(tree["group_size"][g]), g] = 0.0
    gbias = gbias.reshape(1, MC * NI_pad)

    # Per-edge leaf-rank interval and label-smoothing-scaled prior on child edges.
    lo_e = tree["node_lo"][ch].astype(np.float32)
    hi_e = tree["node_hi"][ch].astype(np.float32)
    prior_scaled = ls * (hi_e - lo_e) / float(L)
    edge = np.zeros((3, S_pad), dtype=np.float32)
    edge[0, :S] = lo_e
    edge[1, :S] = hi_e
    edge[2, :S] = prior_scaled                 # padded lanes: lo=hi=0 (never on path), 0

    label_to_rank = tree["leaf_rank"][tree["leaf_subset"]].astype(np.int32)    # (L,)

    return dict(S=S, NI=NI, MC=MC, L=L, S_pad=S_pad, NI_pad=NI_pad,
                A=A, AT=np.ascontiguousarray(A.T), Gcat=Gcat, gbias=gbias, edge=edge,
                label_to_rank=label_to_rank)


# ----------------------------------------------------------------------------
# Pallas kernel
# ----------------------------------------------------------------------------
def hier_softmax_cross_entropy(scores, labels, tree, label_smoothing=0.1, tb=128):
    consts = make_kernel_constants(tree, label_smoothing)
    S, S_pad, NI_pad, MC = consts["S"], consts["S_pad"], consts["NI_pad"], consts["MC"]
    B = scores.shape[0]
    assert scores.shape[1] == S
    ls = float(label_smoothing)

    # Batch tile: 128 rows by default (MXU aligned); clamp for tiny batches.
    tb = _round_up(max(8, min(int(tb), _round_up(B, 8))), 8)
    B_pad = _round_up(B, tb)
    num_tiles = B_pad // tb

    # Glue: map leaf-label id -> DFS leaf rank (tiny static table), pad batch & lanes.
    ranks = jnp.asarray(consts["label_to_rank"])[labels].astype(jnp.float32)   # (B,)
    ranks = jnp.pad(ranks, (0, B_pad - B), constant_values=-1.0).reshape(B_pad, 1)
    scores_p = jnp.pad(scores.astype(jnp.float32), ((0, B_pad - B), (0, S_pad - S)))

    a = jnp.asarray(consts["A"], dtype=jnp.bfloat16)        # 0/1 exact in bf16
    at = jnp.asarray(consts["AT"], dtype=jnp.bfloat16)
    gcat = jnp.asarray(consts["Gcat"], dtype=jnp.bfloat16)
    gbias = jnp.asarray(consts["gbias"])                     # f32  (1, MC*NI_pad)
    edge = jnp.asarray(consts["edge"])                       # f32  (3, S_pad)

    def kernel(ranks_ref, scores_ref, gcat_ref, gbias_ref, a_ref, at_ref, edge_ref,
               out_ref):
        sc = scores_ref[...]                                  # (tb, S_pad)  f32
        rank = ranks_ref[...]                                 # (tb, 1)      f32
        a_m = a_ref[...].astype(jnp.float32)                  # (S_pad, NI_pad)
        at_m = at_ref[...].astype(jnp.float32)                # (NI_pad, S_pad)
        bias = gbias_ref[...]                                 # (1, MC*NI_pad)
        einfo = edge_ref[...]                                 # (3, S_pad)

        # All MC per-group max candidates in ONE wide bf16 MXU matmul (f32 accum).
        # log-sum-exp is shift-invariant, so bf16 rounding of the max is harmless.
        cand = jnp.dot(sc.astype(jnp.bfloat16), gcat_ref[...],
                       preferred_element_type=jnp.float32) + bias   # (tb, MC*NI_pad)
        m_g = cand[:, 0:NI_pad]
        for c in range(1, MC):                                # static unroll, MC is small
            m_g = jnp.maximum(m_g, cand[:, c * NI_pad:(c + 1) * NI_pad])

        gmax = jnp.dot(m_g, at_m, preferred_element_type=jnp.float32)   # (tb, S_pad)
        e = jnp.exp(sc - gmax)                                           # bounded, f32
        gsum = jnp.dot(e, a_m, preferred_element_type=jnp.float32)       # (tb, NI_pad)
        gsum = jnp.maximum(gsum, 1e-30)     # only exactly-zero padded groups get clamped
        lse = jnp.dot(jnp.log(gsum), at_m, preferred_element_type=jnp.float32) + gmax
        # -log p_s == lse - sc   (per-group log-softmax, negated)

        lo = einfo[0:1, :]
        hi = einfo[1:2, :]
        pri = einfo[2:3, :]                                   # already scaled by ls
        on_path = jnp.where((rank >= lo) & (rank < hi), 1.0 - ls, 0.0)   # (tb, S_pad)
        valid = jnp.where(rank >= 0.0, 1.0, 0.0)                         # (tb, 1) batch pad
        target = valid * (on_path + pri)
        contrib = target * (lse - sc)

        # Lane-dense per-tile partial sum; no cross-iteration accumulator so the grid
        # axis can be "parallel" (both TensorCores on v7x).
        out_ref[...] = jnp.sum(contrib, axis=0, keepdims=True)[None, :, :]   # (1,1,S_pad)

    # VMEM sizing: constants + double-buffered tiles + in-kernel intermediates, headroom.
    const_bytes = (S_pad * MC * NI_pad * 2 + 2 * S_pad * NI_pad * 2
                   + 8 * MC * NI_pad * 4 + 8 * S_pad * 4)
    block_bytes = tb * S_pad * 4 + tb * LANE * 4 + 8 * S_pad * 4
    inter_bytes = tb * (MC * NI_pad + 2 * S_pad + 2 * NI_pad) * 4
    vmem_limit = int(min(max(4 * (const_bytes + block_bytes) + inter_bytes + (4 << 20),
                             16 << 20), 48 << 20))

    out = pl.pallas_call(
        kernel,
        out_shape=jax.ShapeDtypeStruct((num_tiles, 1, S_pad), jnp.float32),
        grid=(num_tiles,),
        in_specs=[
            pl.BlockSpec((tb, 1), lambda i: (i, 0)),                 # DFS ranks (4 B/row)
            pl.BlockSpec((tb, S_pad), lambda i: (i, 0)),             # scores tile
            pl.BlockSpec((S_pad, MC * NI_pad), lambda i: (0, 0)),    # Gcat (bf16, const)
            pl.BlockSpec((1, MC * NI_pad), lambda i: (0, 0)),        # gbias
            pl.BlockSpec((S_pad, NI_pad), lambda i: (0, 0)),         # A   (bf16, const)
            pl.BlockSpec((NI_pad, S_pad), lambda i: (0, 0)),         # A^T (bf16, const)
            pl.BlockSpec((3, S_pad), lambda i: (0, 0)),              # lo / hi / ls*prior
        ],
        out_specs=pl.BlockSpec((1, 1, S_pad), lambda i: (i, 0, 0)),
        compiler_params=pltpu.CompilerParams(
            dimension_semantics=("parallel",),
            vmem_limit_bytes=vmem_limit),
    )(ranks, scores_p, gcat, gbias, a, at, edge)

    return jnp.sum(out) / float(B)                                   # torch.mean


# ----------------------------------------------------------------------------
# Pure-JAX reference (transcribes the PyTorch forward literally) for validation.
# ----------------------------------------------------------------------------
def reference_loss(scores, labels, tree, label_smoothing=0.1):
    n = tree["num_nodes"]
    NI = tree["num_internal"]
    MC = tree["max_children"]
    L = tree["num_leaves"]
    M = tree["is_ancestor"][:, tree["leaf_subset"]].T.astype(np.float32)   # (L, N)
    prior = tree["prior"].astype(np.float32)                               # (N,)
    flat_index = tree["group_index"] * MC + tree["col_index"]
    child_index = tree["child_index"]
    B = scores.shape[0]
    labels_oh = jax.nn.one_hot(labels, L, dtype=jnp.float32)
    q = labels_oh @ jnp.asarray(M)
    q = (1.0 - label_smoothing) * q + label_smoothing * jnp.asarray(prior)
    flat = jnp.full((B, NI * MC), -jnp.inf, jnp.float32).at[:, flat_index].set(scores)
    child_logp = jax.nn.log_softmax(flat.reshape(B, NI, MC), axis=-1).reshape(B, NI * MC)
    log_cond_p = jnp.zeros((B, n), jnp.float32).at[:, child_index].set(
        child_logp[:, flat_index])
    xent = jnp.sum(q * (-log_cond_p), axis=-1)
    return jnp.mean(xent)


if __name__ == "__main__":
    # Small deterministic hierarchy: 16 nodes, 6 internal, 10 leaves, 15 child edges.
    parents = np.array([-1, 0, 0, 0, 1, 1, 2, 2, 2, 3, 3, 6, 6, 8, 8, 8])
    tree = build_tree(parents)
    S = tree["num_nodes"] - 1
    L = tree["num_leaves"]

    B = 16
    key = jax.random.PRNGKey(0)
    k_scores, k_labels = jax.random.split(key)
    scores = jax.random.normal(k_scores, (B, S), dtype=jnp.float32)
    labels = jax.random.randint(k_labels, (B,), 0, L)

    loss = hier_softmax_cross_entropy(scores, labels, tree, label_smoothing=0.1)
    loss = jax.block_until_ready(loss)

    ref = jax.block_until_ready(reference_loss(scores, labels, tree, label_smoothing=0.1))
    np.testing.assert_allclose(np.asarray(loss), np.asarray(ref), rtol=5e-5, atol=1e-6)

    print("KERNEL_OK")
</pallas_src>

<mosaic_0001>
module attributes {stable_mosaic.version = 11 : i64} {
  func.func @kernel(%arg0: i32, %arg1: memref<16x1xf32, #tpu.memory_space<vmem>>, %arg2: memref<16x128xf32, #tpu.memory_space<vmem>>, %arg3: memref<128x384xbf16, #tpu.memory_space<vmem>>, %arg4: memref<1x384xf32, #tpu.memory_space<vmem>>, %arg5: memref<128x128xbf16, #tpu.memory_space<vmem>>, %arg6: memref<128x128xbf16, #tpu.memory_space<vmem>>, %arg7: memref<3x128xf32, #tpu.memory_space<vmem>>, %arg8: memref<1x1x128xf32, #tpu.memory_space<vmem>>) attributes {dimension_semantics = [#tpu.dimension_semantics<parallel>], iteration_bounds = array<i64: 1>, scalar_prefetch = 0 : i64, scratch_operands = 0 : i64, tpu.core_type = #tpu.core_type<tc>, window_params = [{transform_indices = @transform_0, window_bounds = array<i64: 16, 1>}, {transform_indices = @transform_1, window_bounds = array<i64: 16, 128>}, {pipeline_mode = #tpu.pipeline_mode<synchronous>, transform_indices = @transform_2, window_bounds = array<i64: 128, 384>}, {pipeline_mode = #tpu.pipeline_mode<synchronous>, transform_indices = @transform_3, window_bounds = array<i64: 1, 384>}, {pipeline_mode = #tpu.pipeline_mode<synchronous>, transform_indices = @transform_4, window_bounds = array<i64: 128, 128>}, {pipeline_mode = #tpu.pipeline_mode<synchronous>, transform_indices = @transform_5, window_bounds = array<i64: 128, 128>}, {pipeline_mode = #tpu.pipeline_mode<synchronous>, transform_indices = @transform_6, window_bounds = array<i64: 3, 128>}, {transform_indices = @transform_7, window_bounds = array<i64: 1, 1, 128>}]} {
    %c0 = arith.constant 0 : index
    %c0_0 = arith.constant 0 : index
    %0 = vector.load %arg2[%c0, %c0_0] : memref<16x128xf32, #tpu.memory_space<vmem>>, vector<16x128xf32>
    %c0_1 = arith.constant 0 : index
    %c0_2 = arith.constant 0 : index
    %1 = vector.load %arg1[%c0_1, %c0_2] : memref<16x1xf32, #tpu.memory_space<vmem>>, vector<16x1xf32>
    %c0_3 = arith.constant 0 : index
    %c0_4 = arith.constant 0 : index
    %2 = vector.load %arg5[%c0_3, %c0_4] : memref<128x128xbf16, #tpu.memory_space<vmem>>, vector<128x128xbf16>
    %3 = arith.extf %2 : vector<128x128xbf16> to vector<128x128xf32>
    %c0_5 = arith.constant 0 : index
    %c0_6 = arith.constant 0 : index
    %4 = vector.load %arg6[%c0_5, %c0_6] : memref<128x128xbf16, #tpu.memory_space<vmem>>, vector<128x128xbf16>
    %5 = arith.extf %4 : vector<128x128xbf16> to vector<128x128xf32>
    %c0_7 = arith.constant 0 : index
    %c0_8 = arith.constant 0 : index
    %6 = vector.load %arg4[%c0_7, %c0_8] : memref<1x384xf32, #tpu.memory_space<vmem>>, vector<1x384xf32>
    %c0_9 = arith.constant 0 : index
    %c0_10 = arith.constant 0 : index
    %7 = vector.load %arg7[%c0_9, %c0_10] : memref<3x128xf32, #tpu.memory_space<vmem>>, vector<3x128xf32>
    %8 = arith.truncf %0 : vector<16x128xf32> to vector<16x128xbf16>
    %c0_11 = arith.constant 0 : index
    %c0_12 = arith.constant 0 : index
    %9 = vector.load %arg3[%c0_11, %c0_12] : memref<128x384xbf16, #tpu.memory_space<vmem>>, vector<128x384xbf16>
    %cst = arith.constant dense<0.000000e+00> : vector<16x384xf32>
    %10 = tpu.matmul %8, %9, %cst {dimension_numbers = #tpu.dot_dimension_numbers<[1], [0], [0], [1], [0, 0, 1, 1], [], []>} : vector<16x128xbf16>, vector<128x384xbf16>, vector<16x384xf32> -> vector<16x384xf32>
    %11 = vector.broadcast %6 : vector<1x384xf32> to vector<16x384xf32>
    %12 = arith.addf %10, %11 : vector<16x384xf32>
    %13 = vector.extract_strided_slice %12 {offsets = [0, 0], sizes = [16, 128], strides = [1, 1]} : vector<16x384xf32> to vector<16x128xf32>
    %14 = vector.extract_strided_slice %12 {offsets = [0, 128], sizes = [16, 128], strides = [1, 1]} : vector<16x384xf32> to vector<16x128xf32>
    %15 = arith.maximumf %13, %14 : vector<16x128xf32>
    %16 = vector.extract_strided_slice %12 {offsets = [0, 256], sizes = [16, 128], strides = [1, 1]} : vector<16x384xf32> to vector<16x128xf32>
    %17 = arith.maximumf %15, %16 : vector<16x128xf32>
    %cst_13 = arith.constant dense<0.000000e+00> : vector<16x128xf32>
    %18 = tpu.matmul %17, %5, %cst_13 {dimension_numbers = #tpu.dot_dimension_numbers<[1], [0], [0], [1], [0, 0, 1, 1], [], []>} : vector<16x128xf32>, vector<128x128xf32>, vector<16x128xf32> -> vector<16x128xf32>
    %19 = arith.subf %0, %18 : vector<16x128xf32>
    %20 = math.exp %19 : vector<16x128xf32>
    %cst_14 = arith.constant dense<0.000000e+00> : vector<16x128xf32>
    %21 = tpu.matmul %20, %3, %cst_14 {dimension_numbers = #tpu.dot_dimension_numbers<[1], [0], [0], [1], [0, 0, 1, 1], [], []>} : vector<16x128xf32>, vector<128x128xf32>, vector<16x128xf32> -> vector<16x128xf32>
    %cst_15 = arith.constant 1.000000e-30 : f32
    %22 = vector.broadcast %cst_15 : f32 to vector<16x128xf32>
    %23 = arith.maximumf %21, %22 : vector<16x128xf32>
    %24 = math.log %23 : vector<16x128xf32>
    %cst_16 = arith.constant dense<0.000000e+00> : vector<16x128xf32>
    %25 = tpu.matmul %24, %5, %cst_16 {dimension_numbers = #tpu.dot_dimension_numbers<[1], [0], [0], [1], [0, 0, 1, 1], [], []>} : vector<16x128xf32>, vector<128x128xf32>, vector<16x128xf32> -> vector<16x128xf32>
    %26 = arith.addf %25, %18 : vector<16x128xf32>
    %27 = vector.extract_strided_slice %7 {offsets = [0, 0], sizes = [1, 128], strides = [1, 1]} : vector<3x128xf32> to vector<1x128xf32>
    %28 = vector.extract_strided_slice %7 {offsets = [1, 0], sizes = [1, 128], strides = [1, 1]} : vector<3x128xf32> to vector<1x128xf32>
    %29 = vector.extract_strided_slice %7 {offsets = [2, 0], sizes = [1, 128], strides = [1, 1]} : vector<3x128xf32> to vector<1x128xf32>
    %30 = vector.broadcast %1 : vector<16x1xf32> to vector<16x128xf32>
    %31 = vector.broadcast %27 : vector<1x128xf32> to vector<16x128xf32>
    %32 = arith.cmpf oge, %30, %31 : vector<16x128xf32>
    %33 = vector.broadcast %1 : vector<16x1xf32> to vector<16x128xf32>
    %34 = vector.broadcast %28 : vector<1x128xf32> to vector<16x128xf32>
    %35 = arith.cmpf olt, %33, %34 : vector<16x128xf32>
    %36 = arith.andi %32, %35 : vector<16x128xi1>
    %cst_17 = arith.constant 0.899999976 : f32
    %cst_18 = arith.constant 0.000000e+00 : f32
    %37 = vector.broadcast %cst_17 : f32 to vector<16x128xf32>
    %38 = vector.broadcast %cst_18 : f32 to vector<16x128xf32>
    %39 = arith.select %36, %37, %38 : vector<16x128xi1>, vector<16x128xf32>
    %cst_19 = arith.constant 0.000000e+00 : f32
    %40 = vector.broadcast %cst_19 : f32 to vector<16x1xf32>
    %41 = arith.cmpf oge, %1, %40 : vector<16x1xf32>
    %cst_20 = arith.constant 1.000000e+00 : f32
    %cst_21 = arith.constant 0.000000e+00 : f32
    %42 = vector.broadcast %cst_20 : f32 to vector<16x1xf32>
    %43 = vector.broadcast %cst_21 : f32 to vector<16x1xf32>
    %44 = arith.select %41, %42, %43 : vector<16x1xi1>, vector<16x1xf32>
    %45 = vector.broadcast %29 : vector<1x128xf32> to vector<16x128xf32>
    %46 = arith.addf %39, %45 : vector<16x128xf32>
    %47 = vector.broadcast %44 : vector<16x1xf32> to vector<16x128xf32>
    %48 = arith.mulf %47, %46 : vector<16x128xf32>
    %49 = arith.subf %26, %0 : vector<16x128xf32>
    %50 = arith.mulf %48, %49 : vector<16x128xf32>
    %cst_22 = arith.constant dense<0.000000e+00> : vector<128xf32>
    %51 = vector.multi_reduction <add>, %50, %cst_22 [0] : vector<16x128xf32> to vector<128xf32>
    %52 = vector.shape_cast %51 : vector<128xf32> to vector<1x128xf32>
    %53 = vector.shape_cast %52 : vector<1x128xf32> to vector<1x1x128xf32>
    %c0_23 = arith.constant 0 : index
    %c0_24 = arith.constant 0 : index
    %c0_25 = arith.constant 0 : index
    %54 = vector.load %arg8[%c0_23, %c0_24, %c0_25] : memref<1x1x128xf32, #tpu.memory_space<vmem>>, vector<1x1x128xf32>
    tpu.vector_store %arg8[%c0_23, %c0_24, %c0_25], %53 {strides = array<i32>} : memref<1x1x128xf32, #tpu.memory_space<vmem>>, vector<1x1x128xf32>,
    return
  }
  func.func @transform_0(%arg0: i32) -> (i32, i32) {
    %c0_i32 = arith.constant 0 : i32
    %c0_i32_0 = arith.constant 0 : i32
    return %arg0, %c0_i32 : i32, i32
  }
  func.func @transform_1(%arg0: i32) -> (i32, i32) {
    %c0_i32 = arith.constant 0 : i32
    %c0_i32_0 = arith.constant 0 : i32
    return %arg0, %c0_i32 : i32, i32
  }
  func.func @transform_2(%arg0: i32) -> (i32, i32) {
    %c0_i32 = arith.constant 0 : i32
    %c0_i32_0 = arith.constant 0 : i32
    %c0_i32_1 = arith.constant 0 : i32
    return %c0_i32, %c0_i32_0 : i32, i32
  }
  func.func @transform_3(%arg0: i32) -> (i32, i32) {
    %c0_i32 = arith.constant 0 : i32
    %c0_i32_0 = arith.constant 0 : i32
    %c0_i32_1 = arith.constant 0 : i32
    return %c0_i32, %c0_i32_0 : i32, i32
  }
  func.func @transform_4(%arg0: i32) -> (i32, i32) {
    %c0_i32 = arith.constant 0 : i32
    %c0_i32_0 = arith.constant 0 : i32
    %c0_i32_1 = arith.constant 0 : i32
    return %c0_i32, %c0_i32_0 : i32, i32
  }
  func.func @transform_5(%arg0: i32) -> (i32, i32) {
    %c0_i32 = arith.constant 0 : i32
    %c0_i32_0 = arith.constant 0 : i32
    %c0_i32_1 = arith.constant 0 : i32
    return %c0_i32, %c0_i32_0 : i32, i32
  }
  func.func @transform_6(%arg0: i32) -> (i32, i32) {
    %c0_i32 = arith.constant 0 : i32
    %c0_i32_0 = arith.constant 0 : i32
    %c0_i32_1 = arith.constant 0 : i32
    return %c0_i32, %c0_i32_0 : i32, i32
  }
  func.func @transform_7(%arg0: i32) -> (i32, i32, i32) {
    %c0_i32 = arith.constant 0 : i32
    %c0_i32_0 = arith.constant 0 : i32
    %c0_i32_1 = arith.constant 0 : i32
    return %arg0, %c0_i32, %c0_i32_0 : i32, i32, i32
  }
}

</mosaic_0001>

<bundles_post_ra>
// kernel: tpu_custom_call.1
= control target key start
LH: loop header
LB: loop body
LE: loop exit
PB: predicated region body
PF: predicated region fallthrough
CT: control target
= control target key end

     0   :  { %12 = vsyncpa [#allocation3], 0  ;;  %s1409_s0 = inlined_call_operand.vmem [shape: f32[16,1], index: 0, kind: input, shape index: {}]   ;;  %s1410_s1 = inlined_call_operand.vmem [shape: f32[16,128], index: 1, kind: input, shape index: {}]   ;;  %s1411_s2 = inlined_call_operand.hbm [shape: bf16[128,384], index: 2, kind: input, shape index: {}]   ;;  %s1412_s3 = inlined_call_operand.hbm [shape: f32[1,384], index: 3, kind: input, shape index: {}]   ;;  %s1413_s4 = inlined_call_operand.hbm [shape: bf16[128,128], index: 4, kind: input, shape index: {}]   ;;  %s1414_s5 = inlined_call_operand.hbm [shape: bf16[128,128], index: 5, kind: input, shape index: {}]   ;;  %s1415_s6 = inlined_call_operand.vmem [shape: f32[3,128], index: 6, kind: input, shape index: {}]   ;;  %s1416_s7 = inlined_call_operand.hbm [shape: f32[1,1,128], index: 7, kind: output, shape index: {}]  }
   0x1   :  { %13 = vsyncpa [#allocation6], 0 }
   0x2   :  { %14 = vsyncpa [#allocation9], 0 }
   0x3   :  { %15 = vsyncpa [#allocation4], 0  ;;  %s1187_s24 = smov [#allocation5]   ;;  %s1188_s26 = smov [#allocation2]  }
   0x4   :  { %s38_s25 = sshll.u32 %s1187_s24, 4  ;;  %s25_s27 = sshll.u32 %s1188_s26, 4  ;;  %s39_s25 = int_to_ptr.vmem [resolvable:$true] %s38_s25  ;;  %s26_s27 = int_to_ptr.vmem [resolvable:$true] %s25_s27 }
   0x5   :  { %s1087_s28 = scalar_lea.vmem %s39_s25, 48  ;;  %s1091_s29 = scalar_lea.vmem %s39_s25, 64 }
   0x6   :  { %p1088_p0 = scmp.ne.s32.totalorder %s39_s25, %s1087_s28  ;;  %p1092_p1 = scmp.lt.s32.totalorder %s39_s25, %s39_s25 }
   0x7   :  { %p1093_p2 = scmp.lt.s32.totalorder %s1091_s29, %s1087_s28 }
   0x9   :  { %p1094_p3 = por %p1093_p2, %p1092_p1 }
   0xb   :  { %p1095_p4 = pnand %p1094_p3, %p1088_p0 }
   0xd   :  { %1098 = shalt.err (!%p1095_p4)
}
   0xe   :  { %41 = dma.hbm_to_vmem [thread:$0]  %s1412_s3, 48, %s39_s25, [#allocation6]  }
   0xf   :  { %s1107_s9 = scalar_lea.vmem %s26_s27, 3072  ;;  %p1112_p6 = scmp.lt.s32.totalorder %s26_s27, %s26_s27 }
  0x10   :  { %p1108_p5 = scmp.ne.s32.totalorder %s26_s27, %s1107_s9  ;;  %p1113_p7 = scmp.lt.s32.totalorder %s1107_s9, %s1107_s9 }
  0x12   :  { %p1114_p8 = por %p1113_p7, %p1112_p6 }
  0x14   :  { %p1115_p9 = pnand %p1114_p8, %p1108_p5 }
  0x16   :  { %1118 = shalt.err (!%p1115_p9)
}
  0x17   :  { %s1189_s10 = smov 192   ;;  %s1190_s11 = smov 12  }
  0x18   :  { %31 = dma.hbm_to_vmem [thread:$0]  %s1411_s2, 3072, %s26_s27, [#allocation3], %s1189_s10, %s1189_s10, %s1190_s11  }
  0x19   :  { %s1191_s14 = smov [#allocation7]  }
  0x1a   :  { %s47_s15 = sshll.u32 %s1191_s14, 4  ;;  %s48_s15 = int_to_ptr.vmem [resolvable:$true] %s47_s15 }
  0x1b   :  { %s1127_s16 = scalar_lea.vmem %s48_s15, 1024  ;;  %p1132_p11 = scmp.lt.s32.totalorder %s48_s15, %s48_s15 }
  0x1c   :  { %p1128_p10 = scmp.ne.s32.totalorder %s48_s15, %s1127_s16  ;;  %p1133_p12 = scmp.lt.s32.totalorder %s1127_s16, %s1127_s16 }
  0x1e   :  { %p1134_p13 = por %p1133_p12, %p1132_p11 }
  0x20   :  { %p1135_p0 = pnand %p1134_p13, %p1128_p10 }
  0x22   :  { %1138 = shalt.err (!%p1135_p0)
}
  0x23   :  { %s1192_s3 = smov 64   ;;  %s1193_s17 = smov 4  }
  0x24   :  { %53 = dma.hbm_to_vmem [thread:$0]  %s1413_s4, 1024, %s48_s15, [#allocation6], %s1192_s3, %s1192_s3, %s1193_s17  }
  0x25   :  { %s1194_s20 = smov [#allocation8]  }
  0x26   :  { %s59_s21 = sshll.u32 %s1194_s20, 4  ;;  %s60_s21 = int_to_ptr.vmem [resolvable:$true] %s59_s21 }
  0x27   :  { %s1147_s2 = scalar_lea.vmem %s60_s21, 1024  ;;  %p1152_p2 = scmp.lt.s32.totalorder %s60_s21, %s60_s21 }
  0x28   :  { %p1148_p1 = scmp.ne.s32.totalorder %s60_s21, %s1147_s2  ;;  %p1153_p3 = scmp.lt.s32.totalorder %s1147_s2, %s1147_s2 }
  0x2a   :  { %p1154_p4 = por %p1153_p3, %p1152_p2 }
  0x2c   :  { %p1155_p5 = pnand %p1154_p4, %p1148_p1 }
  0x2e   :  { %1158 = shalt.err (!%p1155_p5)
}
  0x2f   :  { %65 = dma.hbm_to_vmem [thread:$0]  %s1414_s5, 1024, %s60_s21, [#allocation9], %s1192_s3, %s1192_s3, %s1193_s17  }
  0x30   :  { %1179 = dma.done.wait [#allocation3], 3072  }
  0x31   :  { %1180 = vsyncadd [#allocation3], 4294964224 }
  0x32   :  { %1181 = dma.done.wait [#allocation6], 1072  }
  0x33   :  { %1182 = vsyncadd [#allocation6], 4294966224 }
  0x34   :  { %1183 = dma.done.wait [#allocation9], 1024  }
  0x35   :  { %1184 = vsyncadd [#allocation9], 4294966272  ;;  %v1195_v0 = vmov 0.0   ;;  %vm1196_vm0 = vmmov 0   ;;  %v1197_v1 = vmov 0   ;;  %v831_v24 = vld [vmem:[#allocation8 + $0x38] sm:$0xff]   ;;  %v185_v61 = vlaneseq }
  0x36   :  { %895 = vmatprep.subr.bf16.mxu1 %v1195_v0  ;;  %911 = vmatprep.mubr.msk.bf16.mxu1 %vm1196_vm0, %v1195_v0  ;;  %v1039_v2 = vld [vmem:[#allocation2 + $0xac] ss:$12 sps:$4 sm:$0xff]   ;;  %v1041_v3 = vld [vmem:[#allocation2 + $0xb0] ss:$12 sps:$4 sm:$0xff]   ;;  %v1042_v4 = vld [vmem:[#allocation2 + $0xa8] ss:$12 sps:$4 sm:$0xff]   ;;  %v1270_v29 = vunpack.c.h.bf16 %v831_v24  ;;  %v1275_v32 = vunpack.c.l.bf16 %v831_v24 }
  0x37   :  { %360 = vmatprep.mubr.bf16.mxu0 %v1197_v1  ;;  %1032 = vset.pattern.permute.xlu0 %v1197_v1  ;;  %v1043_v5 = vld [vmem:[#allocation2 + $0x94] ss:$12 sps:$4 sm:$0xff]   ;;  %v1045_v6 = vld [vmem:[#allocation2 + $0x98] ss:$12 sps:$4 sm:$0xff]   ;;  %v1046_v7 = vld [vmem:[#allocation2 + $0x90] ss:$12 sps:$4 sm:$0xff]  }
  0x38   :  { %1033 = vset.pattern.permute.xlu1 %v1197_v1  ;;  %328 = vmatprep.subr.bf16.mxu0 %v1039_v2  ;;  %v1047_v8 = vld [vmem:[#allocation2 + $0x7c] ss:$12 sps:$4 sm:$0xff]   ;;  %v1049_v9 = vld [vmem:[#allocation2 + $0x80] ss:$12 sps:$4 sm:$0xff]   ;;  %v1050_v10 = vld [vmem:[#allocation2 + $0x78] ss:$12 sps:$4 sm:$0xff]  }
  0x39   :  { %896 = vmatpush3.bf16.msra.mxu1 %v1041_v3  ;;  %329 = vmatpush1.bf16.msra.mxu0 %v1042_v4  ;;  %v1051_v11 = vld [vmem:[#allocation2 + $0x64] ss:$12 sps:$4 sm:$0xff]   ;;  %v1053_v12 = vld [vmem:[#allocation2 + $0x68] ss:$12 sps:$4 sm:$0xff]   ;;  %v1054_v13 = vld [vmem:[#allocation2 + $0x60] ss:$12 sps:$4 sm:$0xff]  }
  0x3a   :  { %897 = vmatprep.subr.bf16.mxu1 %v1195_v0  ;;  %330 = vmatprep.subr.bf16.mxu0 %v1043_v5  ;;  %v1055_v14 = vld [vmem:[#allocation2 + $0x4c] ss:$12 sps:$4 sm:$0xff]   ;;  %v1057_v15 = vld [vmem:[#allocation2 + $0x50] ss:$12 sps:$4 sm:$0xff]   ;;  %v1058_v16 = vld [vmem:[#allocation2 + $0x48] ss:$12 sps:$4 sm:$0xff]  }
  0x3b   :  { %v1059_v17 = vld [vmem:[#allocation2 + $0x34] ss:$12 sps:$4 sm:$0xff]   ;;  %v1061_v18 = vld [vmem:[#allocation2 + $0x38] ss:$12 sps:$4 sm:$0xff]   ;;  %v1062_v19 = vld [vmem:[#allocation2 + $0x30] ss:$12 sps:$4 sm:$0xff]  }
  0x3c   :  { %v1063_v20 = vld [vmem:[#allocation2 + $0x1c] ss:$12 sps:$4 sm:$0xff]   ;;  %v1065_v21 = vld [vmem:[#allocation2 + $0x20] ss:$12 sps:$4 sm:$0xff]   ;;  %v1066_v22 = vld [vmem:[#allocation2 + $0x18] ss:$12 sps:$4 sm:$0xff]  }
  0x3d   :  { %898 = vmatpush3.bf16.msra.mxu1 %v1045_v6  ;;  %331 = vmatpush1.bf16.msra.mxu0 %v1046_v7  ;;  %v1067_v23 = vld [vmem:[#allocation2 + $0x4] ss:$12 sps:$4 sm:$0xff]   ;;  %v1069_v25 = vld [vmem:[#allocation2 + $0x8] ss:$12 sps:$4 sm:$0xff]   ;;  %v1070_v28 = vld [vmem:[#allocation2] ss:$12 sps:$4 sm:$0xff]  }
  0x3e   :  { %899 = vmatprep.subr.bf16.mxu1 %v1195_v0  ;;  %332 = vmatprep.subr.bf16.mxu0 %v1047_v8  ;;  %v1262_v26 = vld [vmem:[%s1410_s1] sm:$0xff]  ;;  %v1267_v27 = vld [vmem:[%s1410_s1 + $0x8] sm:$0xff]  ;;  %v830_v31 = vld [vmem:[#allocation8 + $0x30] sm:$0xff]   ;;  %v1340_v62 = vshrl.u32 %v185_v61, 7 }
  0x3f   :  { %v151_v30 = vpack.c.bf16 %v1267_v27, %v1262_v26  ;;  %v1277_v33 = vunpack.c.h.bf16 %v830_v31  ;;  %v829_v34 = vld [vmem:[#allocation8 + $0x28] sm:$0xff]   ;;  %v1281_v35 = vunpack.c.l.bf16 %v830_v31  ;;  %v828_v37 = vld [vmem:[#allocation8 + $0x20] sm:$0xff]   ;;  %v827_v40 = vld [vmem:[#allocation8 + $0x18] sm:$0xff]  }
  0x40   :  { %v1285_v36 = vunpack.c.h.bf16 %v829_v34  ;;  %v1289_v38 = vunpack.c.l.bf16 %v829_v34  ;;  %v1293_v39 = vunpack.c.h.bf16 %v828_v37  ;;  %v1297_v41 = vunpack.c.l.bf16 %v828_v37  ;;  %v826_v44 = vld [vmem:[#allocation8 + $0x10] sm:$0xff]   ;;  %v825_v47 = vld [vmem:[#allocation8 + $0x8] sm:$0xff]   ;;  %v787_v50 = vld [vmem:[#allocation8] sm:$0xff]  }
  0x41   :  { %900 = vmatpush3.bf16.msra.mxu1 %v1049_v9  ;;  %333 = vmatpush1.bf16.msra.mxu0 %v1050_v10  ;;  %v1301_v42 = vunpack.c.h.bf16 %v827_v40  ;;  %v1308_v43 = vunpack.c.l.bf16 %v827_v40  ;;  %v1311_v45 = vunpack.c.h.bf16 %v826_v44  ;;  %v1315_v46 = vunpack.c.l.bf16 %v826_v44  ;;  %v824_v53 = vld [vmem:[#allocation7 + $0x38] sm:$0xff]   ;;  %v823_v54 = vld [vmem:[#allocation7 + $0x30] sm:$0xff]   ;;  %v1337_v58 = vld [vmem:[#allocation7 + $0x28] sm:$0xff]  }
  0x42   :  { %901 = vmatprep.subr.bf16.mxu1 %v1195_v0  ;;  %334 = vmatprep.subr.bf16.mxu0 %v1051_v11  ;;  %v1319_v48 = vunpack.c.h.bf16 %v825_v47  ;;  %v1323_v49 = vunpack.c.l.bf16 %v825_v47  ;;  %v1327_v51 = vunpack.c.h.bf16 %v787_v50  ;;  %v1331_v52 = vunpack.c.l.bf16 %v787_v50  ;;  %v149_v3 = vld [vmem:[#allocation5] sm:$0x7]  ;;  %v819_v34 = vld [vmem:[#allocation7 + $0x10] sm:$0xff]  }
  0x43   :  { %v785_v55 = vunpack.c.h.bf16 %v824_v53  ;;  %v784_v56 = vunpack.c.l.bf16 %v824_v53  ;;  %v781_v57 = vunpack.c.h.bf16 %v823_v54  ;;  %v780_v59 = vunpack.c.l.bf16 %v823_v54  ;;  %v820_v31 = vld [vmem:[#allocation7 + $0x18] sm:$0xff]  }
  0x44   :  { %v777_v60 = vunpack.c.h.bf16 %v1337_v58  ;;  %v195_v63 = vsub.s32 2, %v1340_v62  ;;  %v187_v1 = vsub.s32 0, %v1340_v62  ;;  %v191_v2 = vsub.s32 1, %v1340_v62 }
  0x45   :  { %902 = vmatpush3.bf16.msra.mxu1 %v1053_v12  ;;  %335 = vmatpush1.bf16.msra.mxu0 %v1054_v13  ;;  %v764_v37 = vunpack.c.l.bf16 %v819_v34 }
  0x46   :  { %903 = vmatprep.subr.bf16.mxu1 %v1195_v0  ;;  %336 = vmatprep.subr.bf16.mxu0 %v1055_v14  ;;  %v196_v4 = vrot.slane %v149_v3, %v195_v63  ;;  %v188_v6 = vrot.slane %v149_v3, %v187_v1  ;;  %v192_v7 = vrot.slane %v149_v3, %v191_v2 }
  0x49   :  { %904 = vmatpush3.bf16.msra.mxu1 %v1057_v15  ;;  %337 = vmatpush1.bf16.msra.mxu0 %v1058_v16 }
  0x4a   :  { %905 = vmatprep.subr.bf16.mxu1 %v1195_v0  ;;  %338 = vmatprep.subr.bf16.mxu0 %v1059_v17 }
  0x4d   :  { %906 = vmatpush3.bf16.msra.mxu1 %v1061_v18  ;;  %339 = vmatpush1.bf16.msra.mxu0 %v1062_v19 }
  0x4e   :  { %907 = vmatprep.subr.bf16.mxu1 %v1195_v0  ;;  %340 = vmatprep.subr.bf16.mxu0 %v1063_v20 }
  0x51   :  { %908 = vmatpush3.bf16.msra.mxu1 %v1065_v21  ;;  %341 = vmatpush1.bf16.msra.mxu0 %v1066_v22 }
  0x52   :  { %909 = vmatprep.subr.bf16.mxu1 %v1195_v0  ;;  %342 = vmatprep.subr.bf16.mxu0 %v1067_v23 }
  0x55   :  { %910 = vmatpush3.bf16.msra.mxu1 %v1069_v25  ;;  %343 = vmatpush1.bf16.msra.mxu0 %v1070_v28  ;;  %v776_v25 = vunpack.c.l.bf16 %v1337_v58  ;;  %v821_v28 = vld [vmem:[#allocation7 + $0x20] sm:$0xff]  }
  0x56   :  { %915 = vmatprep.subr.mxu0 %v1270_v29  ;;  %950 = vmatprep.subr.mxu1 %v785_v55 }
  0x58   :  { %912 = vmatmul.mubr.bf16.vlgmr.msra.gmra.mxu1 %v151_v30  ;;  %361 = vmatmul.mubr.bf16.vlgmr.msra.gmra.mxu0 %v151_v30  ;;  %v772_v30 = vunpack.c.l.bf16 %v821_v28 }
  0x59   :  { %916 = vmatpush3.msra.mxu0 %v1270_v29  ;;  %951 = vmatpush3.msra.mxu1 %v785_v55 }
  0x5a   :  { %917 = vmatprep.subr.mxu0 %v1275_v32  ;;  %952 = vmatprep.subr.mxu1 %v784_v56 }
  0x5b   :  { %918 = vmatpush3.msra.mxu0 %v1275_v32  ;;  %953 = vmatpush3.msra.mxu1 %v784_v56 }
  0x5c   :  { %919 = vmatprep.subr.mxu0 %v1277_v33  ;;  %954 = vmatprep.subr.mxu1 %v781_v57 }
  0x5d   :  { %920 = vmatpush3.msra.mxu0 %v1277_v33  ;;  %955 = vmatpush3.msra.mxu1 %v781_v57 }
  0x5e   :  { %921 = vmatprep.subr.mxu0 %v1281_v35  ;;  %956 = vmatprep.subr.mxu1 %v780_v59 }
  0x5f   :  { %922 = vmatpush3.msra.mxu0 %v1281_v35  ;;  %957 = vmatpush3.msra.mxu1 %v780_v59 }
  0x60   :  { %923 = vmatprep.subr.mxu0 %v1285_v36  ;;  %958 = vmatprep.subr.mxu1 %v777_v60 }
  0x61   :  { %924 = vmatpush3.msra.mxu0 %v1285_v36  ;;  %959 = vmatpush3.msra.mxu1 %v777_v60 }
  0x62   :  { %925 = vmatprep.subr.mxu0 %v1289_v38  ;;  %960 = vmatprep.subr.mxu1 %v776_v25 }
  0x63   :  { %926 = vmatpush3.msra.mxu0 %v1289_v38  ;;  %961 = vmatpush3.msra.mxu1 %v776_v25 }
  0x64   :  { %927 = vmatprep.subr.mxu0 %v1293_v39 }
  0x65   :  { %928 = vmatpush3.msra.mxu0 %v1293_v39 }
  0x66   :  { %929 = vmatprep.subr.mxu0 %v1297_v41 }
  0x67   :  { %930 = vmatpush3.msra.mxu0 %v1297_v41 }
  0x68   :  { %931 = vmatprep.subr.mxu0 %v1301_v42 }
  0x69   :  { %932 = vmatpush3.msra.mxu0 %v1301_v42 }
  0x6a   :  { %933 = vmatprep.subr.mxu0 %v1308_v43 }
  0x6b   :  { %934 = vmatpush3.msra.mxu0 %v1308_v43 }
  0x6c   :  { %935 = vmatprep.subr.mxu0 %v1311_v45 }
  0x6d   :  { %936 = vmatpush3.msra.mxu0 %v1311_v45 }
  0x6e   :  { %937 = vmatprep.subr.mxu0 %v1315_v46 }
  0x6f   :  { %938 = vmatpush3.msra.mxu0 %v1315_v46 }
  0x70   :  { %939 = vmatprep.subr.mxu0 %v1319_v48 }
  0x71   :  { %940 = vmatpush3.msra.mxu0 %v1319_v48 }
  0x72   :  { %941 = vmatprep.subr.mxu0 %v1323_v49 }
  0x73   :  { %942 = vmatpush3.msra.mxu0 %v1323_v49 }
  0x74   :  { %943 = vmatprep.subr.mxu0 %v1327_v51 }
  0x75   :  { %944 = vmatpush3.msra.mxu0 %v1327_v51 }
  0x76   :  { %945 = vmatprep.subr.mxu0 %v1331_v52 }
  0x77   :  { %946 = vmatpush3.msra.mxu0 %v1331_v52 }
  0x78   :  { %985 = vmatprep.subr.mxu0 %v1270_v29 }
 0x118   :  { %v405_v5 = vpop.f32.mrf.mxu1  ;;  %v362_v8 = vpop.f32.mrf.mxu0 }
 0x119   :  { %v406_v11 = vadd.f32 %v405_v5, %v196_v4  ;;  %v363_v12 = vadd.f32 %v362_v8, %v188_v6 }
 0x11a   :  { %v913_v9 = vpop.f32.mrf.mxu1  ;;  %v364_v10 = vpop.f32.mrf.mxu0 }
 0x11b   :  { %v365_v13 = vadd.f32 %v364_v10, %v192_v7 }
 0x11c   :  { %v408_v14 = vpop.f32.mrf.mxu1  ;;  %v366_v15 = vpop.f32.mrf.mxu0 }
 0x11d   :  { %v412_v16 = vmax.f32 %v363_v12, %v365_v13  ;;  %v367_v19 = vadd.f32 %v366_v15, %v188_v6  ;;  %v409_v22 = vadd.f32 %v408_v14, %v196_v4  ;;  %v150_v6 = vld [vmem:[%s1415_s6] sm:$0x7]  ;;  %s1198_s6 = smov [#allocation10]  }
 0x11e   :  { %v914_v17 = vpop.f32.mrf.mxu1  ;;  %v368_v18 = vpop.f32.mrf.mxu0  ;;  %v672_v8 = vrot.slane %v150_v6, %v191_v2  ;;  %v686_v10 = vrot.slane %v150_v6, %v195_v63  ;;  %s719_s30 = sshll.u32 %s1198_s6, 4  ;;  %s720_s30 = int_to_ptr.vmem [resolvable:$true] %s719_s30 }
 0x11f   :  { %v369_v20 = vadd.f32 %v368_v18, %v192_v7  ;;  %v414_v21 = vmax.f32 %v412_v16, %v406_v11  ;;  %v666_v7 = vrot.slane %v150_v6, %v187_v1  ;;  %s1159_s8 = scalar_lea.vmem %s720_s30, 16  ;;  %s1163_s9 = scalar_lea.vmem %s720_s30, 32 }
 0x120   :  { %p1160_p6 = scmp.ne.s32.totalorder %s720_s30, %s1159_s8  ;;  %p1164_p7 = scmp.lt.s32.totalorder %s720_s30, %s720_s30 }
 0x121   :  { %v413_v23 = vmax.f32 %v367_v19, %v369_v20  ;;  %947 = vmatprep.mubr.f32.mxu0 %v414_v21  ;;  %p1165_p8 = scmp.lt.s32.totalorder %s1163_s9, %s1159_s8 }
 0x123   :  { %v415_v24 = vmax.f32 %v413_v23, %v409_v22  ;;  %p1166_p9 = por %p1165_p8, %p1164_p7 }
 0x125   :  { %948 = vmatmul.mubr.f32.vlgmr.msra.gmra.mxu0 %v415_v24  ;;  %p1167_p10 = pnand %p1166_p9, %p1160_p6 }
 0x126   :  { %986 = vmatpush3.msra.mxu0 %v1270_v29  ;;  %v773_v29 = vunpack.c.h.bf16 %v821_v28 }
 0x127   :  { %987 = vmatprep.subr.mxu0 %v1275_v32 }
 0x128   :  { %988 = vmatpush3.msra.mxu0 %v1275_v32  ;;  %962 = vmatprep.subr.mxu1 %v773_v29  ;;  %v769_v32 = vunpack.c.h.bf16 %v820_v31 }
 0x129   :  { %989 = vmatprep.subr.mxu0 %v1277_v33  ;;  %963 = vmatpush3.msra.mxu1 %v773_v29 }
 0x12a   :  { %990 = vmatpush3.msra.mxu0 %v1277_v33  ;;  %964 = vmatprep.subr.mxu1 %v772_v30  ;;  %v768_v33 = vunpack.c.l.bf16 %v820_v31 }
 0x12b   :  { %991 = vmatprep.subr.mxu0 %v1281_v35  ;;  %965 = vmatpush3.msra.mxu1 %v772_v30 }
 0x12c   :  { %992 = vmatpush3.msra.mxu0 %v1281_v35  ;;  %966 = vmatprep.subr.mxu1 %v769_v32  ;;  %v818_v35 = vld [vmem:[#allocation7 + $0x8] sm:$0xff]  }
 0x12d   :  { %993 = vmatprep.subr.mxu0 %v1285_v36  ;;  %967 = vmatpush3.msra.mxu1 %v769_v32  ;;  %v760_v40 = vunpack.c.l.bf16 %v818_v35 }
 0x12e   :  { %994 = vmatpush3.msra.mxu0 %v1285_v36  ;;  %968 = vmatprep.subr.mxu1 %v768_v33  ;;  %v765_v36 = vunpack.c.h.bf16 %v819_v34 }
 0x12f   :  { %995 = vmatprep.subr.mxu0 %v1289_v38  ;;  %969 = vmatpush3.msra.mxu1 %v768_v33 }
 0x130   :  { %996 = vmatpush3.msra.mxu0 %v1289_v38  ;;  %970 = vmatprep.subr.mxu1 %v765_v36  ;;  %v761_v38 = vunpack.c.h.bf16 %v818_v35 }
 0x131   :  { %997 = vmatprep.subr.mxu0 %v1293_v39  ;;  %971 = vmatpush3.msra.mxu1 %v765_v36 }
 0x132   :  { %998 = vmatpush3.msra.mxu0 %v1293_v39  ;;  %v755_v39 = vld [vmem:[#allocation7] sm:$0xff]   ;;  %972 = vmatprep.subr.mxu1 %v764_v37 }
 0x133   :  { %999 = vmatprep.subr.mxu0 %v1297_v41  ;;  %973 = vmatpush3.msra.mxu1 %v764_v37 }
 0x134   :  { %1000 = vmatpush3.msra.mxu0 %v1297_v41  ;;  %974 = vmatprep.subr.mxu1 %v761_v38  ;;  %v757_v41 = vunpack.c.h.bf16 %v755_v39 }
 0x135   :  { %1001 = vmatprep.subr.mxu0 %v1301_v42  ;;  %975 = vmatpush3.msra.mxu1 %v761_v38 }
 0x136   :  { %1002 = vmatpush3.msra.mxu0 %v1301_v42  ;;  %976 = vmatprep.subr.mxu1 %v760_v40  ;;  %v756_v42 = vunpack.c.l.bf16 %v755_v39 }
 0x137   :  { %1003 = vmatprep.subr.mxu0 %v1308_v43  ;;  %977 = vmatpush3.msra.mxu1 %v760_v40 }
 0x138   :  { %1004 = vmatpush3.msra.mxu0 %v1308_v43  ;;  %978 = vmatprep.subr.mxu1 %v757_v41 }
 0x139   :  { %1005 = vmatprep.subr.mxu0 %v1311_v45  ;;  %979 = vmatpush3.msra.mxu1 %v757_v41 }
 0x13a   :  { %1006 = vmatpush3.msra.mxu0 %v1311_v45  ;;  %980 = vmatprep.subr.mxu1 %v756_v42 }
 0x13b   :  { %1007 = vmatprep.subr.mxu0 %v1315_v46  ;;  %981 = vmatpush3.msra.mxu1 %v756_v42 }
 0x13c   :  { %1008 = vmatpush3.msra.mxu0 %v1315_v46 }
 0x13d   :  { %1009 = vmatprep.subr.mxu0 %v1319_v48 }
 0x13e   :  { %1010 = vmatpush3.msra.mxu0 %v1319_v48 }
 0x13f   :  { %1011 = vmatprep.subr.mxu0 %v1323_v49 }
 0x140   :  { %1012 = vmatpush3.msra.mxu0 %v1323_v49 }
 0x141   :  { %1013 = vmatprep.subr.mxu0 %v1327_v51 }
 0x142   :  { %1014 = vmatpush3.msra.mxu0 %v1327_v51  ;;  %v83_v51 = vld [vmem:[%s1409_s0] sm:$0xff] }
 0x143   :  { %1015 = vmatprep.subr.mxu0 %v1331_v52  ;;  %655 = vperm.xlu0 %1032, %v83_v51   ;;  %vm679_vm1 = vcmp.ge.f32.partialorder %v83_v51, 0.0 }
 0x144   :  { %1016 = vmatpush3.msra.mxu0 %v1331_v52  ;;  %v84_v52 = vld [vmem:[%s1409_s0 + $0x8] sm:$0xff]  ;;  %v681_v53 = vsel %vm679_vm1, 1.0, %v1195_v0 }
 0x145   :  { %vm680_vm2 = vcmp.ge.f32.partialorder %v84_v52, 0.0 }
 0x146   :  { %v682_v54 = vsel %vm680_vm2, 1.0, %v1195_v0 }
 0x147   :  { %v1034_v55 = vpack.i.bf16 %v682_v54, %v681_v53  ;;  %660 = vperm.xlu0 %1032, %v84_v52  }
 0x149   :  { %1035 = vperm.xlu1 %1033, %v1034_v55  }
 0x1be   :  { %v656_v5 = vpop.permute.xlu0 %655 }
 0x1bf   :  { %vm667_vm3 = vcmp.ge.f32.partialorder %v656_v5, %v666_v7  ;;  %vm673_vm4 = vcmp.lt.f32.partialorder %v656_v5, %v672_v8 }
 0x1c0   :  { %vm675_vm7 = vmand %vm667_vm3, %vm673_vm4 }
 0x1c1   :  { %v677_v11 = vsel %vm675_vm7, 0.9, %v1195_v0 }
 0x1c2   :  { %v661_v9 = vpop.permute.xlu0 %660  ;;  %v687_v14 = vadd.f32 %v686_v10, %v677_v11 }
 0x1c3   :  { %vm668_vm5 = vcmp.ge.f32.partialorder %v661_v9, %v666_v7  ;;  %vm674_vm6 = vcmp.lt.f32.partialorder %v661_v9, %v672_v8 }
 0x1c4   :  { %vm676_vm8 = vmand %vm668_vm5, %vm674_vm6  ;;  %v1036_v13 = vpop.permute.xlu1 %1035 }
 0x1c5   :  { %v678_v12 = vsel %vm676_vm8, 0.9, %v1195_v0  ;;  %v1038_v16 = vunpack.i.h.bf16 %v1036_v13  ;;  %v1037_v2 = vunpack.i.l.bf16 %v1036_v13 }
 0x1c6   :  { %v688_v15 = vadd.f32 %v686_v10, %v678_v12 }
 0x1c7   :  { %v699_v22 = vmul.f32 %v1037_v2, %v687_v14 }
 0x1c8   :  { %v700_v21 = vmul.f32 %v1038_v16, %v688_v15 }
 0x1e5   :  { %v949_v43 = vpop.f32.mrf.mxu0 }
 0x1e6   :  { %v492_v44 = vsub.f32 %v1267_v27, %v949_v43 }
 0x1e7   :  { %v482_v45 = vpop.f32.mrf.mxu0 }
 0x1e8   :  { %v491_v46 = vsub.f32 %v1262_v26, %v482_v45  ;;  %v495_v47 = vmul.f32 1.442695, %v492_v44 }
 0x1ea   :  { %v493_v48 = vmul.f32 1.442695, %v491_v46 }
 0x1ec   :  { %1071 = vpow2.f32 %v493_v48 }
 0x1ed   :  { %1073 = vpow2.f32 %v495_v47 }
 0x1f9   :  { %v1072_v49 = vpop.eup %1071 }
 0x1fa   :  { %v1074_v50 = vpop.eup %1073  ;;  %982 = vmatprep.mubr.f32.mxu1 %v1072_v49 }
 0x1fb   :  { %983 = vmatmul.mubr.f32.vlgmr.msra.gmra.mxu1 %v1074_v50 }
 0x2bb   :  { %v984_v56 = vpop.f32.mrf.mxu1 }
 0x2bc   :  { %v573_v57 = vmax.f32 %v984_v56, 1e-30 }
 0x2bd   :  { %v563_v58 = vpop.f32.mrf.mxu1 }
 0x2be   :  { %v572_v59 = vmax.f32 %v563_v58, 1e-30  ;;  %1075 = vlog2.f32 %v573_v57 }
 0x2c0   :  { %1077 = vlog2.f32 %v572_v59 }
 0x2cb   :  { %v1076_v60 = vpop.eup %1075 }
 0x2cc   :  { %v577_v4 = vmul.f32 0.6931472, %v1076_v60 }
 0x2cd   :  { %v1078_v61 = vpop.eup %1077 }
 0x2ce   :  { %v575_v3 = vmul.f32 0.6931472, %v1078_v61 }
 0x2d0   :  { %1017 = vmatprep.mubr.f32.mxu0 %v575_v3 }
 0x2d1   :  { %1018 = vmatmul.mubr.f32.vlgmr.msra.gmra.mxu0 %v577_v4 }
 0x391   :  { %v1019_v1 = vpop.f32.mrf.mxu0 }
 0x392   :  { %v650_v17 = vadd.f32 %v1019_v1, %v949_v43 }
 0x393   :  { %v644_v18 = vpop.f32.mrf.mxu0 }
 0x394   :  { %v702_v19 = vsub.f32 %v650_v17, %v1267_v27  ;;  %v645_v20 = vadd.f32 %v644_v18, %v482_v45 }
 0x396   :  { %v701_v62 = vsub.f32 %v645_v20, %v1262_v26  ;;  %v704_v63 = vmul.f32 %v702_v19, %v700_v21 }
 0x398   :  { %v703_v23 = vmul.f32 %v701_v62, %v699_v22 }
 0x39a   :  { %v705_v24 = vadd.f32 %v704_v63, %v703_v23 }
 0x39c   :  { %v706_v25 = vrot.slane %v705_v24, 4 }
 0x39e   :  { %v707_v0 = vadd.f32 %v706_v25, %v705_v24 }
 0x3a0   :  { %v708_v28 = vrot.slane %v707_v0, 2 }
 0x3a2   :  { %v709_v29 = vadd.f32 %v708_v28, %v707_v0 }
 0x3a4   :  { %v710_v30 = vrot.slane %v709_v29, 1 }
 0x3a6   :  { %v711_v31 = vadd.f32 %v710_v30, %v709_v29 }
 0x3a8   :  { %712 = vst [vmem:[#allocation10] sm:$0x1] %v711_v31 }
 0x3a9   :  { %1170 = shalt.err (!%p1167_p10)
}
 0x3aa   :  { %722 = dma.vmem_to_hbm [thread:$0]  %s720_s30, 16, %s1416_s7, [#allocation4]  }
 0x3ab   :  { %1185 = dma.done.wait [#allocation4], 16  }
 0x3ac   :  { %1186 = vsyncadd [#allocation4], 4294967280 }
 0x3ad   :  { %726 = vsyncpa [#allocation3], 1 }
 0x3ae   :  { %727 = vsyncpa [#allocation6], 1 }
 0x3af   :  { %728 = vsyncpa [#allocation9], 1 }
 0x3b0   :  { %729 = vsyncpa [#allocation4], 1 }

</bundles_post_ra>
